<compile_context>
chip_gen: v5e
topology: v5e:2x2
jax: 0.10.0
libtpu: 0.0.40
codegen_flags: <defaults>
</compile_context>

<pallas_src>
import jax
import jax.numpy as jnp
from jax import lax
from jax.experimental import pallas as pl
from jax.experimental.pallas import tpu as pltpu

EMBED_DIM = 300
INFLIGHT = 64        # max outstanding row DMAs (one semaphore slot each)
_ISSUE_UNROLL = 8    # unroll factor for the issue / gather loops


def _window(token_block: int) -> int:
    """In-flight window: min(INFLIGHT, token_block), rounded down to a power of 2."""
    w = min(INFLIGHT, token_block)
    return 1 << (w.bit_length() - 1)


# ---------------------------------------------------------------------------
# Path A (large vocab): table stays in HBM (memory_space=pl.ANY); per-row DMA
# gather lands directly in the pipelined output block (no staging copy).
# ---------------------------------------------------------------------------
def _hbm_gather_kernel(ids_ref, table_hbm, out_ref, sems):
    # ids_ref:   (Np,) int32, scalar-prefetched into SMEM
    # table_hbm: (V, D) table, left in HBM
    # out_ref:   (token_block, D) VMEM output block (DMA destination)
    # sems:      (W,) DMA semaphores, one per in-flight slot
    tB, _ = out_ref.shape
    V = table_hbm.shape[0]
    W = _window(tB)
    base = pl.program_id(0) * tB

    def read_id(c):
        # Clamp so a bad token id can never issue an out-of-bounds DMA.
        return jnp.clip(ids_ref[base + c], 0, V - 1)

    def start_copy(c, slot, idx):
        pltpu.make_async_copy(
            table_hbm.at[pl.ds(idx, 1), :],
            out_ref.at[pl.ds(c, 1), :],
            sems.at[slot],
        ).start()

    def wait_slot(slot):
        # Every copy is exactly one (1, D) row of the same dtype and each slot
        # has at most one outstanding copy, so a fixed-row descriptor carries
        # the correct byte count for this slot's wait.
        pltpu.make_async_copy(
            table_hbm.at[pl.ds(0, 1), :],
            out_ref.at[pl.ds(0, 1), :],
            sems.at[slot],
        ).wait()

    # Prologue: fill the window (copy c uses slot c for c < W).
    def _prologue(c, carry):
        start_copy(c, c, read_id(c))
        return carry

    lax.fori_loop(0, W, _prologue, None, unroll=_ISSUE_UNROLL)

    # Steady state: uniform, predicate-free body — wait for the copy that owns
    # this slot, then immediately reuse the slot for the row W ahead.  The SMEM
    # id read happens BEFORE the wait (waits break sst->sld forwarding).
    def _steady(c, carry):
        slot = c & (W - 1)
        idx_next = read_id(c + W)
        wait_slot(slot)
        start_copy(c + W, slot, idx_next)
        return carry

    lax.fori_loop(0, tB - W, _steady, None, unroll=_ISSUE_UNROLL)

    # Epilogue: drain the last W copies (their slots are a permutation of 0..W-1).
    def _drain(c, carry):
        wait_slot(c & (W - 1))
        return carry

    lax.fori_loop(tB - W, tB, _drain, None, unroll=_ISSUE_UNROLL)


# ---------------------------------------------------------------------------
# Path B (table fits VMEM budget): whole table resident in VMEM (single copy,
# un-blocked, no double buffering); gather with dynamic row slices — no per-row
# DMA descriptors at all.
# ---------------------------------------------------------------------------
def _vmem_gather_kernel(ids_ref, table_ref, out_ref):
    tB, _ = out_ref.shape
    V = table_ref.shape[0]
    base = pl.program_id(0) * tB

    def _row(j, carry):
        idx = jnp.clip(ids_ref[base + j], 0, V - 1)
        out_ref[pl.ds(j, 1), :] = table_ref[pl.ds(idx, 1), :]
        return carry

    lax.fori_loop(0, tB, _row, None, unroll=_ISSUE_UNROLL)


def _pick_token_block(n_tokens: int, requested: int) -> int:
    tb = max(8, min(requested, 8 * pl.cdiv(n_tokens, 8)))
    # v7x has two TensorCores and this single grid axis is the only thing
    # sharded across them: make sure small inputs still produce >= 2 blocks.
    # On v5e/v6e (1 TC) large inputs keep tb=requested to amortize ~0.35us/step.
    if n_tokens > 8 and pl.cdiv(n_tokens, tb) < 2:
        tb = max(8, 8 * pl.cdiv(pl.cdiv(n_tokens, 2), 8))
    return tb


def glove_embedding(x, table, *, token_block=512,
                    resident_table_budget_bytes=24 << 20,
                    force_hbm_gather=False):
    """Pallas equivalent of the embedding lookup: table[x] -> (B, L, D)."""
    V, D = table.shape

    flat = x.reshape(-1).astype(jnp.int32)
    N = flat.shape[0]
    token_block = _pick_token_block(N, token_block)
    n_blocks = pl.cdiv(N, token_block)
    Np = n_blocks * token_block
    # Pad with padding_idx=0 (row 0 of the table is the zero row); sliced off below.
    ids_padded = jnp.zeros((Np,), jnp.int32).at[:N].set(flat)

    itemsize = table.dtype.itemsize
    table_bytes = V * D * itemsize
    out_block_bytes = token_block * D * itemsize
    cost = pl.CostEstimate(
        flops=0, transcendentals=0,
        bytes_accessed=Np * 4 + 2 * Np * D * itemsize,  # ids + gathered rows + output
    )

    use_resident = (not force_hbm_gather) and table_bytes <= resident_table_budget_bytes

    if use_resident:
        kernel = _vmem_gather_kernel
        in_specs = [pl.BlockSpec(memory_space=pltpu.MemorySpace.VMEM)]  # whole table, 1 copy
        scratch_shapes = []
        compiler_params = pltpu.CompilerParams(
            dimension_semantics=("parallel",),
            vmem_limit_bytes=max(32 << 20,
                                 table_bytes + 4 * out_block_bytes + (4 << 20)),
        )
    else:
        kernel = _hbm_gather_kernel
        in_specs = [pl.BlockSpec(memory_space=pl.ANY)]  # table stays in HBM
        scratch_shapes = [pltpu.SemaphoreType.DMA((_window(token_block),))]
        compiler_params = pltpu.CompilerParams(
            dimension_semantics=("parallel",),
        )

    out = pl.pallas_call(
        kernel,
        out_shape=jax.ShapeDtypeStruct((Np, D), table.dtype),
        grid_spec=pltpu.PrefetchScalarGridSpec(
            num_scalar_prefetch=1,
            grid=(n_blocks,),
            in_specs=in_specs,
            out_specs=pl.BlockSpec((token_block, D), lambda i, ids: (i, 0)),
            scratch_shapes=scratch_shapes,
        ),
        compiler_params=compiler_params,
        cost_estimate=cost,
    )(ids_padded, table)

    return out[:N].reshape(*x.shape, D)


def init_embedding_table(key, vocab_size, embed_dim=EMBED_DIM):
    # Deterministic synthetic stand-in for pretrained vectors.
    table = 0.1 * jax.random.normal(key, (vocab_size, embed_dim), dtype=jnp.float32)
    # nn.Embedding(padding_idx=0): row 0 is all zeros in the forward pass.
    table = table.at[0].set(0.0)
    return table


if __name__ == "__main__":
    key = jax.random.PRNGKey(0)
    k_tab, k_idx, k_tab2, k_idx2 = jax.random.split(key, 4)

    # --- small test, consistent with forward(x): x = (batch, seq_len) ids ---
    V, D = 64, EMBED_DIM
    table = init_embedding_table(k_tab, V)                 # (64, 300)
    B, L = 2, 8
    x = jax.random.randint(k_idx, (B, L), 0, V, dtype=jnp.int32)
    x = x.at[0, 0].set(0).at[1, 3].set(0)                  # exercise padding_idx=0
    ref = jnp.take(table, x, axis=0)

    out_res = jax.block_until_ready(glove_embedding(x, table))          # VMEM-resident path
    assert out_res.shape == (B, L, D) and out_res.dtype == jnp.float32
    assert bool(jnp.allclose(out_res, ref, atol=1e-6)), "resident-path mismatch (small)"

    out_hbm = jax.block_until_ready(
        glove_embedding(x, table, force_hbm_gather=True))               # HBM DMA-gather path
    assert bool(jnp.allclose(out_hbm, ref, atol=1e-6)), "hbm-path mismatch (small)"

    # --- multi-block test: bigger vocab, 2 token blocks, both paths ---
    V2 = 2048
    table2 = init_embedding_table(k_tab2, V2)
    B2, L2 = 4, 256                                        # 1024 tokens -> 2 blocks of 512
    x2 = jax.random.randint(k_idx2, (B2, L2), 0, V2, dtype=jnp.int32)
    ref2 = jnp.take(table2, x2, axis=0)

    out2_hbm = jax.block_until_ready(
        glove_embedding(x2, table2, force_hbm_gather=True))             # exercises W=64 window
    assert out2_hbm.shape == (B2, L2, D)
    assert bool(jnp.allclose(out2_hbm, ref2, atol=1e-6)), "hbm-path mismatch (large)"

    out2_res = jax.block_until_ready(glove_embedding(x2, table2))
    assert bool(jnp.allclose(out2_res, ref2, atol=1e-6)), "resident-path mismatch (large)"

    print("KERNEL_OK")
</pallas_src>

<mosaic_0001>
module attributes {stable_mosaic.version = 11 : i64} {
  func.func @_vmem_gather_kernel(%arg0: i32, %arg1: memref<16xi32, #tpu.memory_space<smem>>, %arg2: memref<64x300xf32, #tpu.memory_space<vmem>>, %arg3: memref<8x300xf32, #tpu.memory_space<vmem>>) attributes {dimension_semantics = [#tpu.dimension_semantics<parallel>], iteration_bounds = array<i64: 2>, scalar_prefetch = 1 : i64, scratch_operands = 0 : i64, tpu.core_type = #tpu.core_type<tc>, window_params = [{pipeline_mode = #tpu.pipeline_mode<synchronous>, transform_indices = @transform_0, window_bounds = array<i64: 64, 300>}, {transform_indices = @transform_1, window_bounds = array<i64: 8, 300>}]} {
    %c8_i32 = arith.constant 8 : i32
    %0 = arith.muli %arg0, %c8_i32 : i32
    %c0_i32 = arith.constant 0 : i32
    %1 = arith.addi %0, %c0_i32 : i32
    %2 = arith.index_cast %1 : i32 to index
    %3 = memref.load %arg1[%2] : memref<16xi32, #tpu.memory_space<smem>>
    %c0_i32_0 = arith.constant 0 : i32
    %c63_i32 = arith.constant 63 : i32
    %4 = arith.maxsi %c0_i32_0, %3 : i32
    %5 = arith.minsi %c63_i32, %4 : i32
    %6 = arith.index_cast %5 : i32 to index
    %c0 = arith.constant 0 : index
    %7 = vector.load %arg2[%6, %c0] : memref<64x300xf32, #tpu.memory_space<vmem>>, vector<1x300xf32>
    %8 = arith.index_cast %c0_i32 : i32 to index
    %c0_1 = arith.constant 0 : index
    %9 = vector.load %arg3[%8, %c0_1] : memref<8x300xf32, #tpu.memory_space<vmem>>, vector<1x300xf32>
    tpu.vector_store %arg3[%8, %c0_1], %7 {strides = array<i32>} : memref<8x300xf32, #tpu.memory_space<vmem>>, vector<1x300xf32>,
    %c1_i32 = arith.constant 1 : i32
    %10 = arith.addi %0, %c1_i32 : i32
    %11 = arith.index_cast %10 : i32 to index
    %12 = memref.load %arg1[%11] : memref<16xi32, #tpu.memory_space<smem>>
    %c0_i32_2 = arith.constant 0 : i32
    %c63_i32_3 = arith.constant 63 : i32
    %13 = arith.maxsi %c0_i32_2, %12 : i32
    %14 = arith.minsi %c63_i32_3, %13 : i32
    %15 = arith.index_cast %14 : i32 to index
    %c0_4 = arith.constant 0 : index
    %16 = vector.load %arg2[%15, %c0_4] : memref<64x300xf32, #tpu.memory_space<vmem>>, vector<1x300xf32>
    %17 = arith.index_cast %c1_i32 : i32 to index
    %c0_5 = arith.constant 0 : index
    %18 = vector.load %arg3[%17, %c0_5] : memref<8x300xf32, #tpu.memory_space<vmem>>, vector<1x300xf32>
    tpu.vector_store %arg3[%17, %c0_5], %16 {strides = array<i32>} : memref<8x300xf32, #tpu.memory_space<vmem>>, vector<1x300xf32>,
    %c2_i32 = arith.constant 2 : i32
    %19 = arith.addi %0, %c2_i32 : i32
    %20 = arith.index_cast %19 : i32 to index
    %21 = memref.load %arg1[%20] : memref<16xi32, #tpu.memory_space<smem>>
    %c0_i32_6 = arith.constant 0 : i32
    %c63_i32_7 = arith.constant 63 : i32
    %22 = arith.maxsi %c0_i32_6, %21 : i32
    %23 = arith.minsi %c63_i32_7, %22 : i32
    %24 = arith.index_cast %23 : i32 to index
    %c0_8 = arith.constant 0 : index
    %25 = vector.load %arg2[%24, %c0_8] : memref<64x300xf32, #tpu.memory_space<vmem>>, vector<1x300xf32>
    %26 = arith.index_cast %c2_i32 : i32 to index
    %c0_9 = arith.constant 0 : index
    %27 = vector.load %arg3[%26, %c0_9] : memref<8x300xf32, #tpu.memory_space<vmem>>, vector<1x300xf32>
    tpu.vector_store %arg3[%26, %c0_9], %25 {strides = array<i32>} : memref<8x300xf32, #tpu.memory_space<vmem>>, vector<1x300xf32>,
    %c3_i32 = arith.constant 3 : i32
    %28 = arith.addi %0, %c3_i32 : i32
    %29 = arith.index_cast %28 : i32 to index
    %30 = memref.load %arg1[%29] : memref<16xi32, #tpu.memory_space<smem>>
    %c0_i32_10 = arith.constant 0 : i32
    %c63_i32_11 = arith.constant 63 : i32
    %31 = arith.maxsi %c0_i32_10, %30 : i32
    %32 = arith.minsi %c63_i32_11, %31 : i32
    %33 = arith.index_cast %32 : i32 to index
    %c0_12 = arith.constant 0 : index
    %34 = vector.load %arg2[%33, %c0_12] : memref<64x300xf32, #tpu.memory_space<vmem>>, vector<1x300xf32>
    %35 = arith.index_cast %c3_i32 : i32 to index
    %c0_13 = arith.constant 0 : index
    %36 = vector.load %arg3[%35, %c0_13] : memref<8x300xf32, #tpu.memory_space<vmem>>, vector<1x300xf32>
    tpu.vector_store %arg3[%35, %c0_13], %34 {strides = array<i32>} : memref<8x300xf32, #tpu.memory_space<vmem>>, vector<1x300xf32>,
    %c4_i32 = arith.constant 4 : i32
    %37 = arith.addi %0, %c4_i32 : i32
    %38 = arith.index_cast %37 : i32 to index
    %39 = memref.load %arg1[%38] : memref<16xi32, #tpu.memory_space<smem>>
    %c0_i32_14 = arith.constant 0 : i32
    %c63_i32_15 = arith.constant 63 : i32
    %40 = arith.maxsi %c0_i32_14, %39 : i32
    %41 = arith.minsi %c63_i32_15, %40 : i32
    %42 = arith.index_cast %41 : i32 to index
    %c0_16 = arith.constant 0 : index
    %43 = vector.load %arg2[%42, %c0_16] : memref<64x300xf32, #tpu.memory_space<vmem>>, vector<1x300xf32>
    %44 = arith.index_cast %c4_i32 : i32 to index
    %c0_17 = arith.constant 0 : index
    %45 = vector.load %arg3[%44, %c0_17] : memref<8x300xf32, #tpu.memory_space<vmem>>, vector<1x300xf32>
    tpu.vector_store %arg3[%44, %c0_17], %43 {strides = array<i32>} : memref<8x300xf32, #tpu.memory_space<vmem>>, vector<1x300xf32>,
    %c5_i32 = arith.constant 5 : i32
    %46 = arith.addi %0, %c5_i32 : i32
    %47 = arith.index_cast %46 : i32 to index
    %48 = memref.load %arg1[%47] : memref<16xi32, #tpu.memory_space<smem>>
    %c0_i32_18 = arith.constant 0 : i32
    %c63_i32_19 = arith.constant 63 : i32
    %49 = arith.maxsi %c0_i32_18, %48 : i32
    %50 = arith.minsi %c63_i32_19, %49 : i32
    %51 = arith.index_cast %50 : i32 to index
    %c0_20 = arith.constant 0 : index
    %52 = vector.load %arg2[%51, %c0_20] : memref<64x300xf32, #tpu.memory_space<vmem>>, vector<1x300xf32>
    %53 = arith.index_cast %c5_i32 : i32 to index
    %c0_21 = arith.constant 0 : index
    %54 = vector.load %arg3[%53, %c0_21] : memref<8x300xf32, #tpu.memory_space<vmem>>, vector<1x300xf32>
    tpu.vector_store %arg3[%53, %c0_21], %52 {strides = array<i32>} : memref<8x300xf32, #tpu.memory_space<vmem>>, vector<1x300xf32>,
    %c6_i32 = arith.constant 6 : i32
    %55 = arith.addi %0, %c6_i32 : i32
    %56 = arith.index_cast %55 : i32 to index
    %57 = memref.load %arg1[%56] : memref<16xi32, #tpu.memory_space<smem>>
    %c0_i32_22 = arith.constant 0 : i32
    %c63_i32_23 = arith.constant 63 : i32
    %58 = arith.maxsi %c0_i32_22, %57 : i32
    %59 = arith.minsi %c63_i32_23, %58 : i32
    %60 = arith.index_cast %59 : i32 to index
    %c0_24 = arith.constant 0 : index
    %61 = vector.load %arg2[%60, %c0_24] : memref<64x300xf32, #tpu.memory_space<vmem>>, vector<1x300xf32>
    %62 = arith.index_cast %c6_i32 : i32 to index
    %c0_25 = arith.constant 0 : index
    %63 = vector.load %arg3[%62, %c0_25] : memref<8x300xf32, #tpu.memory_space<vmem>>, vector<1x300xf32>
    tpu.vector_store %arg3[%62, %c0_25], %61 {strides = array<i32>} : memref<8x300xf32, #tpu.memory_space<vmem>>, vector<1x300xf32>,
    %c7_i32 = arith.constant 7 : i32
    %64 = arith.addi %0, %c7_i32 : i32
    %65 = arith.index_cast %64 : i32 to index
    %66 = memref.load %arg1[%65] : memref<16xi32, #tpu.memory_space<smem>>
    %c0_i32_26 = arith.constant 0 : i32
    %c63_i32_27 = arith.constant 63 : i32
    %67 = arith.maxsi %c0_i32_26, %66 : i32
    %68 = arith.minsi %c63_i32_27, %67 : i32
    %69 = arith.index_cast %68 : i32 to index
    %c0_28 = arith.constant 0 : index
    %70 = vector.load %arg2[%69, %c0_28] : memref<64x300xf32, #tpu.memory_space<vmem>>, vector<1x300xf32>
    %71 = arith.index_cast %c7_i32 : i32 to index
    %c0_29 = arith.constant 0 : index
    %72 = vector.load %arg3[%71, %c0_29] : memref<8x300xf32, #tpu.memory_space<vmem>>, vector<1x300xf32>
    tpu.vector_store %arg3[%71, %c0_29], %70 {strides = array<i32>} : memref<8x300xf32, #tpu.memory_space<vmem>>, vector<1x300xf32>,
    %c8_i32_30 = arith.constant 8 : i32
    return
  }
  func.func @transform_0(%arg0: i32, %arg1: memref<16xi32, #tpu.memory_space<smem>>) -> (i32, i32) {
    %c0_i32 = arith.constant 0 : i32
    %c0_i32_0 = arith.constant 0 : i32
    %c0_i32_1 = arith.constant 0 : i32
    return %c0_i32, %c0_i32_0 : i32, i32
  }
  func.func @transform_1(%arg0: i32, %arg1: memref<16xi32, #tpu.memory_space<smem>>) -> (i32, i32) {
    %c0_i32 = arith.constant 0 : i32
    %c0_i32_0 = arith.constant 0 : i32
    return %arg0, %c0_i32 : i32, i32
  }
}

</mosaic_0001>

<bundles_post_ra>
// kernel: tpu_custom_call.1
= control target key start
LH: loop header
LB: loop body
LE: loop exit
PB: predicated region body
PF: predicated region fallthrough
CT: control target
= control target key end

     0   :  { %s615_s12 = smov [#allocation3]   ;;  %s804_s0 = inlined_call_operand.hbm [shape: s32[16], index: 0, kind: input, shape index: {}]   ;;  %s805_s1 = inlined_call_operand.hbm [shape: f32[64,300], index: 1, kind: input, shape index: {}]   ;;  %s806_s2 = inlined_call_operand.hbm [shape: f32[16,300], index: 2, kind: output, shape index: {}]  }
   0x1   :  { %s8_s11 = sshll.u32 %s804_s0, 4  ;;  %s9_s11 = int_to_ptr.hbm [resolvable:$true] %s8_s11 }
   0x2   :  { %11 = dma.hbm_to_smem %s9_s11, 16, %s615_s12, [#allocation2] }
   0x3   :  { %589 = dma.done.wait [#allocation2], 16 }
   0x4   :  { %590 = vsyncadd [#allocation2], 4294967280 }
   0x5   :  { %14 = sfence }
   0x6   :  { %15 = vsyncpa [#allocation5], 0 }
   0x7   :  { %16 = vsyncpa [#allocation6], 0 }
   0x8   :  { %18 = vsyncpa [#allocation6 + $0x1], 0  ;;  %s637_s13 = smov 0   ;;  %s639_s14 = smov 0  }
   0x9   :  { %s641_s15 = smov 0   ;;  %s643_s16 = smov 0  }
   0xa LB: > { %s658_s0 = sadd.s32 4294967295, %s613_s16   ;;  %s368_s17 = sadd.s32 4294967294, %s613_s16   ;;  %s613_s16 = sphi %s643_s16, %s814_s16   ;;  %s609_s15 = sphi %s641_s15, %s813_s15   ;;  %s605_s14 = sphi %s639_s14, %s812_s14   ;;  %s601_s13 = sphi %s637_s13, %s811_s13  }
   0xb   : > { %s662_s18 = sadd.s32 1, %s613_s16   ;;  %s52_s19 = sadd.s32 1, %s609_s15 }
   0xc   : > { %s49_s20 = ssub.s32 %s613_s16, %s662_s18  ;;  %p62_p0 = scmp.ne.s32.totalorder %s609_s15, %s605_s14 }
   0xd   : > { %p50_p1 = scmp.eq.s32.totalorder %s49_s20, 0  ;;  %p63_p2 = scmp.eq.s32.totalorder %s658_s0, 1 }
   0xe   : > { %p68_p3 = scmp.ne.s32.totalorder %s605_s14, %s601_s13  ;;  %p69_p4 = scmp.eq.s32.totalorder %s368_s17, 1 }
   0xf   : > { %s673_s21 = scalar_select %p50_p1, %s609_s15, %s52_s19  }
  0x10   : > { %p675_p5 = por %p63_p2, %p62_p0  ;;  %p679_p6 = por %p69_p4, %p68_p3 }
  0x11   : > { %p369_p7 = scmp.ge.s32.totalorder %s613_s16, 1  ;;  %p76_p8 = scmp.lt.s32.totalorder %s613_s16, 3 }
  0x12   : > { %p464_p9 = scmp.eq.s32.totalorder %s658_s0, 0  ;;  %s87_s26 = sshll.u32 %s805_s1, 4  ;;  %s88_s26 = int_to_ptr.hbm [resolvable:$true] %s87_s26 }
  0x13   : > { %p77_p10 = pnand %p369_p7, %p76_p8  ;;  %s616_s27 = smov [#allocation4]  }
  0x14   : > { %s89_s28 = sshll.u32 %s616_s27, 4  ;;  %s617_s29 = smov 384   ;;  %s90_s28 = int_to_ptr.vmem [resolvable:$true] %s89_s28 }
  0x15   : > { %p456_p11 = pneg %p77_p10  ;;  %s618_s30 = smov 24  }
  0x16   : > { %105 = sbr.rel (%p77_p10) target bundleno = 89 (0x59), region = 24 }
  0x17   : > { %p457_p12 = pnand %p464_p9, %p456_p11 }
  0x19   : > { %459 = dma.hbm_to_vmem [thread:$0]  (!%p457_p12), %s88_s26, 3072, %s90_s28, [#allocation5], %s617_s29, %s617_s29, %s618_s30  }
  0x1b   : > { %592 = dma.done.wait (%p464_p9), [#allocation5], 3072  }
  0x1c   : > { %594 = vsyncadd (%p464_p9), [#allocation5], 4294964224  ;;  %s118_s3 = sand.u32 1, %s605_s14   ;;  %s697_s4 = sshll.u32 %s658_s0, 3  ;;  %v136_v0 = vlaneseq }
  0x1d   : > { %s701_s5 = smul.u32 24, %s118_s3  ;;  %s122_s6 = sld [smem:[#allocation3 + %s697_s4]] }
  0x1e   : > { %s142_s7 = sadd.s32 1, %s697_s4  ;;  %s160_s9 = sadd.s32 2, %s697_s4  ;;  %vm717_vm0 = vcmp.lt.s32.totalorder %v136_v0, 300 }
  0x1f   : > { %s143_s8 = sld [smem:[#allocation3 + %s142_s7]]  ;;  %s178_s10 = sadd.s32 3, %s697_s4 }
  0x20   : > { %s707_s11 = sld [smem:[#allocation3 + %s160_s9]]  ;;  %s196_s12 = sadd.s32 4, %s697_s4 }
  0x21   : > { %s710_s17 = sld [smem:[#allocation3 + %s178_s10]]  ;;  %s214_s19 = sadd.s32 5, %s697_s4 }
  0x22   : > { %s713_s20 = sld [smem:[#allocation3 + %s196_s12]]  ;;  %s232_s24 = sadd.s32 6, %s697_s4 }
  0x23   : > { %p123_p13 = scmp.gt.s32.totalorder %s122_s6, 0  ;;  %p374_p0 = scmp.lt.s32.totalorder %s122_s6, 63 }
  0x25   : > { %s816_s6 = smov (!%p123_p13, %s122_s6), 0  ;;  %p144_p1 = scmp.gt.s32.totalorder %s143_s8, 0 }
  0x26   : > { %p380_p2 = scmp.lt.s32.totalorder %s143_s8, 63  ;;  %s818_s6 = smov (!%p374_p0, %s816_s6), 63 }
  0x27   : > { %s820_s8 = smov (!%p144_p1, %s143_s8), 0  ;;  %s127_s25 = sshra.s32 %s818_s6, 3 }
  0x28   : > { %s130_s26 = sand.u32 7, %s818_s6  ;;  %s379_s27 = smul.u32 24, %s127_s25 }
  0x29   : > { %p162_p3 = scmp.gt.s32.totalorder %s707_s11, 0  ;;  %s822_s8 = smov (!%p380_p2, %s820_s8), 63 }
  0x2a   : > { %s133_s28 = sadd.s32 %s379_s27, %s130_s26  ;;  %p387_p4 = scmp.lt.s32.totalorder %s707_s11, 63 }
  0x2b   : > { %s148_s29 = sshra.s32 %s822_s8, 3  ;;  %s134_s30 = scalar_lea.vmem [#allocation4], %s133_s28 }
  0x2c   : > { %v135_v2 = vld [vmem:[%s134_s30] ss:$8 sm:$0x7]  ;;  %s151_s7 = sand.u32 7, %s822_s8  ;;  %s385_s9 = smul.u32 24, %s148_s29 }
  0x2d   : > { %s723_s6 = scalar_lea.vmem [#allocation7], %s701_s5  ;;  %p180_p7 = scmp.gt.s32.totalorder %s710_s17, 0 }
  0x2e   : > { %140 = vst.msk [vmem:[%s723_s6] ss:$8 sm:$0x7] %vm717_vm0, %v135_v2  ;;  %s163_s10 = scalar_select %p162_p3, %s707_s11, 0 }
  0x2f   : > { %s154_s12 = sadd.s32 %s385_s9, %s151_s7  ;;  %p394_p8 = scmp.lt.s32.totalorder %s710_s17, 63 }
  0x30   : > { %s155_s25 = scalar_lea.vmem [#allocation4], %s154_s12  ;;  %s824_s10 = smov (!%p387_p4, %s163_s10), 63 }
  0x31   : > { %v156_v3 = vld [vmem:[%s155_s25] ss:$8 sm:$0x7]  ;;  %s826_s17 = smov (!%p180_p7, %s710_s17), 0  ;;  %s166_s5 = sshra.s32 %s824_s10, 3 }
  0x32   : > { %386 = vst.msk [vmem:[%s723_s6 + $0x1] ss:$8 sm:$0x7] %vm717_vm0, %v156_v3  ;;  %s169_s8 = sand.u32 7, %s824_s10  ;;  %s392_s26 = smul.u32 24, %s166_s5 }
  0x33   : > { %p198_p9 = scmp.gt.s32.totalorder %s713_s20, 0  ;;  %s828_s17 = smov (!%p394_p8, %s826_s17), 63 }
  0x34   : > { %s172_s27 = sadd.s32 %s392_s26, %s169_s8  ;;  %p401_p10 = scmp.lt.s32.totalorder %s713_s20, 63 }
  0x35   : > { %s184_s11 = sshra.s32 %s828_s17, 3  ;;  %s173_s28 = scalar_lea.vmem [#allocation4], %s172_s27 }
  0x36   : > { %v174_v4 = vld [vmem:[%s173_s28] ss:$8 sm:$0x7]  ;;  %s187_s29 = sand.u32 7, %s828_s17  ;;  %s399_s30 = smul.u32 24, %s184_s11 }
  0x37   : > { %393 = vst.msk [vmem:[%s723_s6 + $0x2] ss:$8 sm:$0x7] %vm717_vm0, %v174_v4  ;;  %s830_s20 = smov (!%p198_p9, %s713_s20), 0  ;;  %s215_s9 = sld [smem:[#allocation3 + %s214_s19]] }
  0x38   : > { %s190_s7 = sadd.s32 %s399_s30, %s187_s29  ;;  %s233_s10 = sld [smem:[#allocation3 + %s232_s24]] }
  0x39   : > { %s191_s12 = scalar_lea.vmem [#allocation4], %s190_s7  ;;  %s832_s20 = smov (!%p401_p10, %s830_s20), 63 }
  0x3a   : > { %v192_v5 = vld [vmem:[%s191_s12] ss:$8 sm:$0x7]  ;;  %s250_s25 = sadd.s32 7, %s697_s4  ;;  %s449_s5 = smul.u32 24, %s658_s0 }
  0x3b   : > { %400 = vst.msk [vmem:[%s723_s6 + $0x3] ss:$8 sm:$0x7] %vm717_vm0, %v192_v5  ;;  %s202_s17 = sshra.s32 %s832_s20, 3  ;;  %s205_s8 = sand.u32 7, %s832_s20 }
  0x3c   : > { %s406_s26 = smul.u32 24, %s202_s17  ;;  %s752_s27 = sld [smem:[#allocation3 + %s250_s25]] }
  0x3d   : > { %p216_p11 = scmp.gt.s32.totalorder %s215_s9, 0  ;;  %p408_p12 = scmp.lt.s32.totalorder %s215_s9, 63 }
  0x3e   : > { %s208_s11 = sadd.s32 %s406_s26, %s205_s8  ;;  %p234_p13 = scmp.gt.s32.totalorder %s233_s10, 0 }
  0x3f   : > { %p415_p0 = scmp.lt.s32.totalorder %s233_s10, 63  ;;  %s209_s19 = scalar_lea.vmem [#allocation4], %s208_s11 }
  0x40   : > { %v210_v6 = vld [vmem:[%s209_s19] ss:$8 sm:$0x7]  ;;  %s834_s9 = smov (!%p216_p11, %s215_s9), 0  ;;  %s836_s10 = smov (!%p234_p13, %s233_s10), 0 }
  0x41   : > { %407 = vst.msk [vmem:[%s723_s6 + $0x4] ss:$8 sm:$0x7] %vm717_vm0, %v210_v6  ;;  %s838_s9 = smov (!%p408_p12, %s834_s9), 63  ;;  %s840_s10 = smov (!%p415_p0, %s836_s10), 63 }
  0x42   : > { %s220_s4 = sshra.s32 %s838_s9, 3  ;;  %s223_s20 = sand.u32 7, %s838_s9 }
  0x43   : > { %s413_s24 = smul.u32 24, %s220_s4  ;;  %s238_s28 = sshra.s32 %s840_s10, 3 }
  0x44   : > { %s241_s29 = sand.u32 7, %s840_s10  ;;  %s420_s30 = smul.u32 24, %s238_s28 }
  0x45   : > { %s226_s7 = sadd.s32 %s413_s24, %s223_s20  ;;  %p252_p1 = scmp.gt.s32.totalorder %s752_s27, 0 }
  0x46   : > { %s244_s12 = sadd.s32 %s420_s30, %s241_s29  ;;  %s227_s25 = scalar_lea.vmem [#allocation4], %s226_s7 }
  0x47   : > { %v228_v7 = vld [vmem:[%s227_s25] ss:$8 sm:$0x7]  ;;  %p422_p2 = scmp.lt.s32.totalorder %s752_s27, 63  ;;  %s245_s17 = scalar_lea.vmem [#allocation4], %s244_s12 }
  0x48   : > { %414 = vst.msk [vmem:[%s723_s6 + $0x5] ss:$8 sm:$0x7] %vm717_vm0, %v228_v7  ;;  %v246_v8 = vld [vmem:[%s245_s17] ss:$8 sm:$0x7]  ;;  %s280_s8 = scalar_lea.hbm %s806_s2, %s449_s5 }
  0x49   : > { %421 = vst.msk [vmem:[%s723_s6 + $0x6] ss:$8 sm:$0x7] %vm717_vm0, %v246_v8  ;;  %s842_s27 = smov (!%p252_p1, %s752_s27), 0  ;;  %s282_s26 = sshll.u32 %s723_s6, 4  ;;  %s283_s26 = int_to_ptr.vmem [resolvable:$true] %s282_s26 }
  0x4a   : > { %s844_s27 = smov (!%p422_p2, %s842_s27), 63  ;;  %s284_s20 = sshll.u32 %s280_s8, 4  ;;  %s285_s20 = int_to_ptr.hbm [resolvable:$true] %s284_s20 }
  0x4b   : > { %s256_s11 = sshra.s32 %s844_s27, 3  ;;  %s259_s19 = sand.u32 7, %s844_s27 }
  0x4c   : > { %s427_s4 = smul.u32 24, %s256_s11  ;;  %s269_s0 = scalar_lea.sflag [#allocation6], %s118_s3 }
  0x4d   : > { %s559_s29 = sshra.s32 %s285_s20, 4  ;;  %s565_s7 = scalar_lea.hbm %s806_s2, 48  ;;  %s560_s29 = int_to_ptr.hbm [resolvable:$true] %s559_s29 }
  0x4e   : > { %s262_s24 = sadd.s32 %s427_s4, %s259_s19  ;;  %s561_s5 = scalar_lea.hbm %s560_s29, 24 }
  0x4f   : > { %s263_s28 = scalar_lea.vmem [#allocation4], %s262_s24  ;;  %p562_p3 = scmp.ne.s32.totalorder %s560_s29, %s561_s5 }
  0x50   : > { %v264_v9 = vld [vmem:[%s263_s28] ss:$8 sm:$0x7]  ;;  %p566_p8 = scmp.lt.s32.totalorder %s560_s29, %s806_s2  ;;  %p567_p9 = scmp.lt.s32.totalorder %s565_s7, %s561_s5 }
  0x51   : > { %428 = vst.msk [vmem:[%s723_s6 + $0x7] ss:$8 sm:$0x7] %vm717_vm0, %v264_v9  ;;  %p563_p4 = pnand %p562_p3, %p675_p5 }
  0x52   : > { %p568_p10 = por %p567_p9, %p566_p8 }
  0x53   : > { %p564_p7 = pneg %p563_p4 }
  0x55   : > { %p569_p11 = pnand %p568_p10, %p564_p7 }
  0x57   : > { %572 = shalt.err (!%p569_p11)
}
  0x58   : > { %454 = dma.vmem_to_hbm [thread:$0]  (%p675_p5), %s283_s26, 384, %s285_s20, %s269_s0  }
  0x59 PF: > { %p466_p12 = scmp.ge.s32.totalorder %s613_s16, 2  ;;  %s296_s3 = sand.u32 1, %s601_s13  }
  0x5a   : > { %s297_s6 = scalar_lea.sflag [#allocation6], %s296_s3 }
  0x5b   : > { %p461_p13 = pnand %p466_p12, %p679_p6 }
  0x5d   : > { %p462_p0 = pneg %p461_p13 }
  0x5f   : > { %596 = dma.done.wait (%p462_p0), %s297_s6, 384  }
  0x60   : > { %598 = vsyncadd (%p462_p0), %s297_s6, 4294966912  ;;  %p21_p1 = scmp.ge.s32.totalorder %s662_s18, 4   ;;  %s811_s13 = smov %s605_s14 }
  0x61   : > { %s812_s14 = smov %s609_s15  ;;  %s813_s15 = smov %s673_s21 }
  0x62   : > { %s814_s16 = smov %s662_s18  ;;  %23 = sbr.rel (!%p21_p1) target bundleno = 10 (0xa), region = 76 }
  0x67   :  { %303 = vsyncpa [#allocation5], 1 }
  0x68   :  { %305 = vsyncpa [#allocation5 + $0x1], 1 }
  0x69   :  { %306 = vsyncpa [#allocation6], 1 }
  0x6a   :  { %308 = vsyncpa [#allocation6 + $0x1], 1 }

</bundles_post_ra>
